<compile_context>
chip_gen: v6e
topology: v6e:2x2x1
jax: 0.10.0
libtpu: 0.0.40
codegen_flags: <defaults>
</compile_context>

<pallas_src>
import jax
import jax.numpy as jnp
from jax.experimental import pallas as pl
from jax.experimental.pallas import tpu as pltpu

# ---- small, module-consistent sizes -----------------------------------------
RESIZE = 32            # stands in for resize_size=256
CROP = 16              # stands in for crop_size=224
CHANNELS = 3
NUM_CLASSES = 128      # synthetic backbone output width (lane-dense)
FEAT = CHANNELS * CROP * CROP

NORM_MEAN = (0.485, 0.456, 0.406)
NORM_STD = (0.229, 0.224, 0.225)
RESCALE = 1.0 / 255.0

# TODO(synk): fermion_ops.ImageDecodeOp (libjpeg decode + bilinear resize) has no
# Pallas equivalent; kernel starts from decoded/resized uint8 NHWC images.
# TODO(synk): torch.jit.load('trace_model_zhi_...half.pt') is an opaque traced
# backbone; replaced here by a deterministic bf16 linear head.


def fermion_kernel(x_ref, w_ref, b_ref, o_ref, acc_ref):
    """Grid = (batch_tiles, k_tiles); k (reduction) is the last / fastest axis.

    x_ref:   (TB, TK)            bfloat16   raw pixel values (preprocess folded into W)
    w_ref:   (TK, NUM_CLASSES)   bfloat16   folded weight slab for this K tile
    b_ref:   (1, NUM_CLASSES)    float32    folded bias
    o_ref:   (TB, NUM_CLASSES)   bfloat16
    acc_ref: (TB, NUM_CLASSES)   float32    VMEM accumulator (resident across k)
    """
    k = pl.program_id(1)

    @pl.when(k == 0)
    def _():
        # bias folded into the accumulator init -> added exactly once per output tile
        acc_ref[...] = jnp.broadcast_to(b_ref[...], acc_ref.shape)

    # single bf16 MXU matmul per grid step, f32 accumulation
    acc_ref[...] += jnp.dot(x_ref[...], w_ref[...],
                            preferred_element_type=jnp.float32)

    @pl.when(k == pl.num_programs(1) - 1)
    def _():
        o_ref[...] = acc_ref[...].astype(o_ref.dtype)


def fold_preprocess_into_weights(w_bf16, bias_f32):
    """Fold x*(1/255), -mean, /std (per channel) into the classifier weight/bias.

    logits = sum_r ((x_r/255 - mean_c)/std_c) * W[r, :] + b
           = sum_r x_r * (W[r, :] * RESCALE/std_c)  +  (b - sum_r (mean_c/std_c)*W[r, :])
    Fold is done in float32; folded weight is then cast to bf16, folded bias stays f32.
    """
    w_f32 = w_bf16.astype(jnp.float32)
    mean = jnp.asarray(NORM_MEAN, jnp.float32)
    std = jnp.asarray(NORM_STD, jnp.float32)
    ch = jnp.arange(FEAT, dtype=jnp.int32) // (CROP * CROP)     # NCHW-flatten row -> channel
    scale = (RESCALE / std)[ch]                                 # (FEAT,)
    shift = (mean / std)[ch]                                    # (FEAT,)
    w_folded = (w_f32 * scale[:, None]).astype(jnp.bfloat16)
    b_folded = bias_f32 - jnp.sum(shift[:, None] * w_f32, axis=0, keepdims=True)
    return w_folded, b_folded


def fermion_forward(decoded_images_u8, w_bf16, bias_f32, *, tb=128, tk=256):
    """decoded_images_u8: (B, RESIZE, RESIZE, CHANNELS) uint8 NHWC (decode output)."""
    B = decoded_images_u8.shape[0]
    off = (RESIZE - CROP) // 2

    # Layout plumbing outside the kernel (exact, no arithmetic):
    # CenterCrop in NHWC (so the border is never DMA'd), NHWC -> NCHW permute
    # (matches self.transpose = [0, 3, 1, 2]), flatten to a lane-dense (B, FEAT) slab,
    # and cast uint8 -> bf16 (exact for 0..255).
    x = decoded_images_u8[:, off:off + CROP, off:off + CROP, :]
    x = jnp.transpose(x, (0, 3, 1, 2)).reshape(B, FEAT).astype(jnp.bfloat16)

    # Preprocess affine folded into the weights/bias (float32 fold, bf16 weight).
    w_folded, b_folded = fold_preprocess_into_weights(w_bf16, bias_f32)

    # Pad batch up to a multiple of TB (MXU-sized M tile); pad rows sliced off below.
    # For production B on v7x pick tb so that B/tb >= 2 (two TensorCores).
    b_pad = pl.cdiv(B, tb) * tb
    if b_pad != B:
        x = jnp.pad(x, ((0, b_pad - B), (0, 0)))

    # K tile must divide FEAT (fall back to a single K step otherwise).
    if FEAT % tk != 0:
        tk = FEAT
    n_btile = b_pad // tb
    n_ktile = FEAT // tk

    out = pl.pallas_call(
        fermion_kernel,
        out_shape=jax.ShapeDtypeStruct((b_pad, NUM_CLASSES), jnp.bfloat16),
        grid_spec=pltpu.PrefetchScalarGridSpec(
            num_scalar_prefetch=0,
            grid=(n_btile, n_ktile),                       # reduction axis last
            in_specs=[
                pl.BlockSpec((tb, tk), lambda i, k: (i, k)),               # activations
                pl.BlockSpec((tk, NUM_CLASSES), lambda i, k: (k, 0)),      # folded weight
                pl.BlockSpec((1, NUM_CLASSES), lambda i, k: (0, 0)),       # folded bias
            ],
            out_specs=pl.BlockSpec((tb, NUM_CLASSES), lambda i, k: (i, 0)),
            scratch_shapes=[pltpu.VMEM((tb, NUM_CLASSES), jnp.float32)],
        ),
        compiler_params=pltpu.CompilerParams(
            dimension_semantics=("parallel", "arbitrary"),
            # sized so weight-tile double buffers + activation tiles + accumulator
            # stay under v7x's 64 MiB physical VMEM at production FEAT
            vmem_limit_bytes=48 * 1024 * 1024,
        ),
    )(x, w_folded, b_folded)

    return out[:B]


def reference_forward(decoded_images_u8, w_bf16, bias_f32):
    """Pure-JAX reference with the original (un-folded) module semantics."""
    x = jnp.transpose(decoded_images_u8.astype(jnp.float32), (0, 3, 1, 2))
    off = (RESIZE - CROP) // 2
    x = x[:, :, off:off + CROP, off:off + CROP]
    x = x * RESCALE
    mean = jnp.asarray(NORM_MEAN, jnp.float32).reshape(1, 3, 1, 1)
    std = jnp.asarray(NORM_STD, jnp.float32).reshape(1, 3, 1, 1)
    x = (x - mean) / std
    feat = x.reshape(x.shape[0], -1).astype(jnp.bfloat16)          # ".half()"
    logits = jnp.dot(feat, w_bf16, preferred_element_type=jnp.float32)
    return (logits + bias_f32).astype(jnp.bfloat16)


if __name__ == "__main__":
    key = jax.random.PRNGKey(0)
    k_img, k_w, k_b = jax.random.split(key, 3)

    batch = 2
    # what ImageDecodeOp would hand back: resized uint8 NHWC images
    images = jax.random.randint(
        k_img, (batch, RESIZE, RESIZE, CHANNELS), 0, 256, dtype=jnp.int32
    ).astype(jnp.uint8)

    # deterministic synthetic backbone parameters
    w = (jax.random.normal(k_w, (FEAT, NUM_CLASSES), jnp.float32) * 0.02).astype(jnp.bfloat16)
    bias = jax.random.normal(k_b, (1, NUM_CLASSES), jnp.float32) * 0.01

    out = jax.block_until_ready(fermion_forward(images, w, bias))
    ref = jax.block_until_ready(reference_forward(images, w, bias))

    assert out.shape == (batch, NUM_CLASSES) and out.dtype == jnp.bfloat16
    assert jnp.allclose(out.astype(jnp.float32), ref.astype(jnp.float32),
                        atol=5e-2, rtol=5e-2)

    print("KERNEL_OK")
</pallas_src>

<mosaic_0001>
module attributes {stable_mosaic.version = 11 : i64} {
  func.func @fermion_kernel(%arg0: i32, %arg1: i32, %arg2: memref<128x256xbf16, #tpu.memory_space<vmem>>, %arg3: memref<256x128xbf16, #tpu.memory_space<vmem>>, %arg4: memref<1x128xf32, #tpu.memory_space<vmem>>, %arg5: memref<128x128xbf16, #tpu.memory_space<vmem>>, %arg6: memref<128x128xf32, #tpu.memory_space<vmem>>) attributes {dimension_semantics = [#tpu.dimension_semantics<parallel>, #tpu.dimension_semantics<arbitrary>], iteration_bounds = array<i64: 1, 3>, scalar_prefetch = 0 : i64, scratch_operands = 1 : i64, tpu.core_type = #tpu.core_type<tc>, window_params = [{transform_indices = @transform_0, window_bounds = array<i64: 128, 256>}, {transform_indices = @transform_1, window_bounds = array<i64: 256, 128>}, {pipeline_mode = #tpu.pipeline_mode<synchronous>, transform_indices = @transform_2, window_bounds = array<i64: 1, 128>}, {transform_indices = @transform_3, window_bounds = array<i64: 128, 128>}]} {
    %c0_i32 = arith.constant 0 : i32
    %0 = arith.cmpi eq, %arg1, %c0_i32 : i32
    %1 = arith.extui %0 : i1 to i32
    %c0_i32_0 = arith.constant 0 : i32
    %2 = arith.cmpi ne, %1, %c0_i32_0 : i32
    scf.if %2 {
      %c0_9 = arith.constant 0 : index
      %c0_10 = arith.constant 0 : index
      %12 = vector.load %arg4[%c0_9, %c0_10] : memref<1x128xf32, #tpu.memory_space<vmem>>, vector<1x128xf32>
      %13 = vector.shape_cast %12 : vector<1x128xf32> to vector<1x128xf32>
      %14 = vector.broadcast %13 : vector<1x128xf32> to vector<128x128xf32>
      %c0_11 = arith.constant 0 : index
      %c0_12 = arith.constant 0 : index
      %15 = vector.load %arg6[%c0_11, %c0_12] : memref<128x128xf32, #tpu.memory_space<vmem>>, vector<128x128xf32>
      tpu.vector_store %arg6[%c0_11, %c0_12], %14 {strides = array<i32>} : memref<128x128xf32, #tpu.memory_space<vmem>>, vector<128x128xf32>,
    } else {
    }
    %c0 = arith.constant 0 : index
    %c0_1 = arith.constant 0 : index
    %3 = vector.load %arg6[%c0, %c0_1] : memref<128x128xf32, #tpu.memory_space<vmem>>, vector<128x128xf32>
    %c0_2 = arith.constant 0 : index
    %c0_3 = arith.constant 0 : index
    %4 = vector.load %arg2[%c0_2, %c0_3] : memref<128x256xbf16, #tpu.memory_space<vmem>>, vector<128x256xbf16>
    %c0_4 = arith.constant 0 : index
    %c0_5 = arith.constant 0 : index
    %5 = vector.load %arg3[%c0_4, %c0_5] : memref<256x128xbf16, #tpu.memory_space<vmem>>, vector<256x128xbf16>
    %cst = arith.constant dense<0.000000e+00> : vector<128x128xf32>
    %6 = tpu.matmul %4, %5, %cst {dimension_numbers = #tpu.dot_dimension_numbers<[1], [0], [0], [1], [0, 0, 1, 1], [], []>} : vector<128x256xbf16>, vector<256x128xbf16>, vector<128x128xf32> -> vector<128x128xf32>
    %7 = arith.addf %3, %6 : vector<128x128xf32>
    %c0_6 = arith.constant 0 : index
    %c0_7 = arith.constant 0 : index
    %8 = vector.load %arg6[%c0_6, %c0_7] : memref<128x128xf32, #tpu.memory_space<vmem>>, vector<128x128xf32>
    tpu.vector_store %arg6[%c0_6, %c0_7], %7 {strides = array<i32>} : memref<128x128xf32, #tpu.memory_space<vmem>>, vector<128x128xf32>,
    %c2_i32 = arith.constant 2 : i32
    %9 = arith.cmpi eq, %arg1, %c2_i32 : i32
    %10 = arith.extui %9 : i1 to i32
    %c0_i32_8 = arith.constant 0 : i32
    %11 = arith.cmpi ne, %10, %c0_i32_8 : i32
    scf.if %11 {
      %c0_9 = arith.constant 0 : index
      %c0_10 = arith.constant 0 : index
      %12 = vector.load %arg6[%c0_9, %c0_10] : memref<128x128xf32, #tpu.memory_space<vmem>>, vector<128x128xf32>
      %13 = arith.truncf %12 : vector<128x128xf32> to vector<128x128xbf16>
      %c0_11 = arith.constant 0 : index
      %c0_12 = arith.constant 0 : index
      %14 = vector.load %arg5[%c0_11, %c0_12] : memref<128x128xbf16, #tpu.memory_space<vmem>>, vector<128x128xbf16>
      tpu.vector_store %arg5[%c0_11, %c0_12], %13 {strides = array<i32>} : memref<128x128xbf16, #tpu.memory_space<vmem>>, vector<128x128xbf16>,
    } else {
    }
    return
  }
  func.func @transform_0(%arg0: i32, %arg1: i32) -> (i32, i32) {
    %c0_i32 = arith.constant 0 : i32
    return %arg0, %arg1 : i32, i32
  }
  func.func @transform_1(%arg0: i32, %arg1: i32) -> (i32, i32) {
    %c0_i32 = arith.constant 0 : i32
    %c0_i32_0 = arith.constant 0 : i32
    return %arg1, %c0_i32 : i32, i32
  }
  func.func @transform_2(%arg0: i32, %arg1: i32) -> (i32, i32) {
    %c0_i32 = arith.constant 0 : i32
    %c0_i32_0 = arith.constant 0 : i32
    %c0_i32_1 = arith.constant 0 : i32
    return %c0_i32, %c0_i32_0 : i32, i32
  }
  func.func @transform_3(%arg0: i32, %arg1: i32) -> (i32, i32) {
    %c0_i32 = arith.constant 0 : i32
    %c0_i32_0 = arith.constant 0 : i32
    return %arg0, %c0_i32 : i32, i32
  }
}

</mosaic_0001>

<bundles_post_ra>
// kernel: tpu_custom_call.1
= control target key start
LH: loop header
LB: loop body
LE: loop exit
PB: predicated region body
PF: predicated region fallthrough
CT: control target
= control target key end

     0   :  { %8 = vsyncpa [#allocation4], 0  ;;  %s1519_s0 = inlined_call_operand.hbm [shape: bf16[128,768], index: 0, kind: input, shape index: {}]   ;;  %s1520_s1 = inlined_call_operand.hbm [shape: bf16[768,128], index: 1, kind: input, shape index: {}]   ;;  %s1521_s2 = inlined_call_operand.vmem [shape: f32[1,128], index: 2, kind: input, shape index: {}]   ;;  %s1522_s3 = inlined_call_operand.hbm [shape: bf16[128,128], index: 3, kind: output, shape index: {}]  }
   0x1   :  { %10 = vsyncpa [#allocation4 + $0x1], 0 }
   0x2   :  { %11 = vsyncpa [#allocation7], 0 }
   0x3   :  { %13 = vsyncpa [#allocation7 + $0x1], 0 }
   0x4   :  { %14 = vsyncpa [#allocation5], 0  ;;  %s1335_s12 = smov 0   ;;  %s1337_s13 = smov 0  }
   0x5   :  { %s1339_s14 = smov 0   ;;  %s1341_s15 = smov 0  }
   0x6   :  { %s1343_s16 = smov 0   ;;  %s1345_s17 = smov 0  }
   0x7 LB: > { %s839_s18 = sadd.s32 4294967295, %s1303_s17   ;;  %s29_s19 = sadd.s32 1, %s1299_s16  ;;  %s1303_s17 = sphi %s1345_s17, %s20_s17   ;;  %s1299_s16 = sphi %s1343_s16, %s1532_s16   ;;  %s1295_s15 = sphi %s1341_s15, %s1531_s15   ;;  %s1291_s14 = sphi %s1339_s14, %s1530_s14   ;;  %s1287_s13 = sphi %s1337_s13, %s1529_s13   ;;  %s1283_s12 = sphi %s1335_s12, %s1528_s12  }
   0x8   : > { %p30_p0 = scmp.ge.s32.totalorder %s29_s19, 3  ;;  %s41_s20 = sadd.s32 1, %s1291_s14 }
   0x9   : > { %p48_p1 = scmp.ne.s32.totalorder %s1291_s14, %s1287_s13  ;;  %p49_p2 = scmp.eq.s32.totalorder %s1303_s17, 0 }
   0xa   : > { %s1534_s19 = smov (%p30_p0, %s29_s19), 0  ;;  %p54_p4 = scmp.ne.s32.totalorder %s1287_s13, %s1283_s12 }
   0xb   : > { %p1371_p3 = por %p49_p2, %p48_p1  ;;  %s37_s22 = ssub.s32 %s1299_s16, %s1534_s19 }
   0xc   : > { %p55_p5 = scmp.eq.s32.totalorder %s839_s18, 0  ;;  %p39_p6 = scmp.eq.s32.totalorder %s37_s22, 0 }
   0xd   : > { %p1066_p8 = scmp.lt.s32.totalorder %s1303_s17, 3  ;;  %s1389_s25 = sand.u32 1, %s1291_s14  }
   0xe   : > { %p1380_p7 = por %p55_p5, %p54_p4  ;;  %s906_s26 = sshll.u32 %s1299_s16, 7 }
   0xf   : > { %s1386_s24 = scalar_select %p39_p6, %s1291_s14, %s41_s20  }
  0x10   : > { %s842_s27 = sshll.u32 %s1389_s25, 7  ;;  %s167_s30 = scalar_lea.hbm %s1519_s0, %s906_s26 }
  0x11   : > { %s158_s4 = scalar_lea.vmem [#allocation3], %s842_s27  ;;  %p1400_p9 = pnand %p1066_p8, %p1371_p3 }
  0x12   : > { %s168_s5 = sshll.u32 %s158_s4, 4  ;;  %p848_p10 = scmp.ge.s32.totalorder %s1303_s17, 1  ;;  %s169_s5 = int_to_ptr.vmem [resolvable:$true] %s168_s5 }
  0x13   : > { %s155_s7 = scalar_lea.sflag [#allocation4], %s1389_s25  ;;  %p1167_p11 = pneg %p1400_p9 }
  0x14   : > { %s1178_s8 = scalar_lea.vmem %s169_s5, 2048  ;;  %s1305_s9 = smov [#allocation3]  }
  0x15   : > { %p1179_p12 = scmp.ne.s32.totalorder %s169_s5, %s1178_s8  ;;  %s1183_s10 = sshll.u32 %s1305_s9, 4  ;;  %s1184_s10 = int_to_ptr.vmem [resolvable:$false] %s1183_s10 }
  0x16   : > { %s1185_s11 = scalar_lea.vmem %s1184_s10, 4096  ;;  %p1186_p1 = scmp.lt.s32.totalorder %s169_s5, %s1184_s10 }
  0x17   : > { %p1181_p13 = pnand %p1179_p12, %p1167_p11  ;;  %p1187_p2 = scmp.lt.s32.totalorder %s1185_s11, %s1178_s8 }
  0x19   : > { %p1182_p0 = pneg %p1181_p13  ;;  %p1188_p3 = por %p1187_p2, %p1186_p1 }
  0x1b   : > { %p1189_p4 = pnand %p1188_p3, %p1182_p0 }
  0x1d   : > { %1192 = shalt.err (!%p1189_p4)
}
  0x1e   : > { %s1306_s12 = smov 384   ;;  %s1307_s20 = smov 128  }
  0x1f   : > { %s1308_s21 = smov 8   ;;  %p197_p5 = scmp.lt.s32.totalorder %s1303_s17, 4 }
  0x20   : > { %1062 = dma.hbm_to_vmem [thread:$0]  (!%p1400_p9), %s167_s30, 2048, %s169_s5, %s155_s7, %s1306_s12, %s1307_s20, %s1308_s21  }
  0x21   : > { %s907_s22 = sshll.u32 %s1299_s16, 11  ;;  %p1417_p6 = pnand %p848_p10, %p197_p5 }
  0x22   : > { %s188_s4 = scalar_lea.hbm %s1520_s1, %s907_s22  ;;  %s182_s8 = scalar_lea.vmem [#allocation6], %s842_s27 }
  0x23   : > { %s189_s9 = sshll.u32 %s182_s8, 4  ;;  %s179_s10 = scalar_lea.sflag [#allocation7], %s1389_s25  ;;  %s190_s9 = int_to_ptr.vmem [resolvable:$true] %s189_s9 }
  0x24   : > { %s1206_s11 = scalar_lea.vmem %s190_s9, 2048  ;;  %s1309_s30 = smov [#allocation6]  }
  0x25   : > { %p1207_p8 = scmp.ne.s32.totalorder %s190_s9, %s1206_s11  ;;  %s1211_s5 = sshll.u32 %s1309_s30, 4  ;;  %s1212_s5 = int_to_ptr.vmem [resolvable:$false] %s1211_s5 }
  0x26   : > { %s1213_s7 = scalar_lea.vmem %s1212_s5, 4096  ;;  %p1214_p10 = scmp.lt.s32.totalorder %s190_s9, %s1212_s5 }
  0x27   : > { %p1209_p12 = pnand %p1207_p8, %p1167_p11  ;;  %p1215_p0 = scmp.lt.s32.totalorder %s1213_s7, %s1206_s11 }
  0x29   : > { %p1210_p13 = pneg %p1209_p12  ;;  %p1216_p1 = por %p1215_p0, %p1214_p10 }
  0x2b   : > { %p1217_p2 = pnand %p1216_p1, %p1210_p13 }
  0x2d   : > { %1220 = shalt.err (!%p1217_p2)
}
  0x2e   : > { %s1310_s12 = smov 64   ;;  %s1311_s27 = smov 4  }
  0x2f   : > { %1065 = dma.hbm_to_vmem [thread:$0]  (!%p1400_p9), %s188_s4, 2048, %s190_s9, %s179_s10, %s1310_s12, %s1310_s12, %s1311_s27  }
  0x30   : > { %201 = sbr.rel (%p1417_p6) target bundleno = 360 (0x168), region = 32  ;;  %s203_s25 = sand.u32 (!%p1417_p6), 1, %s1287_s13  }
  0x31   : > { %s849_s20 = sshll.u32 (!%p1417_p6), %s203_s25, 7  ;;  %s204_s21 = scalar_lea.sflag (!%p1417_p6), [#allocation4], %s203_s25 }
  0x32   : > { %s1435_s22 = scalar_lea.vmem (!%p1417_p6), [#allocation3], %s849_s20 }
  0x35   : > { %1270 = dma.done.wait (%p1380_p7), %s204_s21, 2048  }
  0x36   : > { %1272 = vsyncadd (%p1380_p7), %s204_s21, 4294965248  ;;  %s213_s28 = scalar_lea.sflag [#allocation7], %s203_s25  ;;  %s1441_s29 = scalar_lea.vmem [#allocation6], %s849_s20 }
  0x37   : > { %1274 = dma.done.wait (%p1380_p7), %s213_s28, 2048  }
  0x38   : > { %1276 = vsyncadd (%p1380_p7), %s213_s28, 4294965248  ;;  %p851_p9 = scmp.ne.s32.totalorder %s1295_s15, 0 }
  0x3a   : > { %247 = sbr.rel (%p851_p9) target bundleno = 72 (0x48), region = 44 }
  0x3f   : > { %v852_v0 = vld [vmem:[%s1521_s2] ss:$0 sm:$0xff] }
  0x40   : > { %255 = vst [vmem:[#allocation2 + $0x30] sm:$0xff] %v852_v0  ;;  %256 = vst [vmem:[#allocation2] sm:$0xff] %v852_v0 }
  0x41   : > { %257 = vst [vmem:[#allocation2 + $0x58] sm:$0xff] %v852_v0  ;;  %258 = vst [vmem:[#allocation2 + $0x18] sm:$0xff] %v852_v0 }
  0x42   : > { %259 = vst [vmem:[#allocation2 + $0x50] sm:$0xff] %v852_v0  ;;  %260 = vst [vmem:[#allocation2 + $0x68] sm:$0xff] %v852_v0 }
  0x43   : > { %261 = vst [vmem:[#allocation2 + $0x8] sm:$0xff] %v852_v0  ;;  %262 = vst [vmem:[#allocation2 + $0x48] sm:$0xff] %v852_v0 }
  0x44   : > { %263 = vst [vmem:[#allocation2 + $0x40] sm:$0xff] %v852_v0  ;;  %264 = vst [vmem:[#allocation2 + $0x20] sm:$0xff] %v852_v0 }
  0x45   : > { %265 = vst [vmem:[#allocation2 + $0x10] sm:$0xff] %v852_v0  ;;  %266 = vst [vmem:[#allocation2 + $0x38] sm:$0xff] %v852_v0 }
  0x46   : > { %267 = vst [vmem:[#allocation2 + $0x60] sm:$0xff] %v852_v0  ;;  %268 = vst [vmem:[#allocation2 + $0x70] sm:$0xff] %v852_v0 }
  0x47   : > { %269 = vst [vmem:[#allocation2 + $0x78] sm:$0xff] %v852_v0  ;;  %270 = vst [vmem:[#allocation2 + $0x28] sm:$0xff] %v852_v0 }
  0x48 PF: > { %v1125_v1 = vld [vmem:[%s1441_s29 + $0x78] sm:$0xff]   ;;  %v1127_v3 = vld [vmem:[%s1441_s29 + $0x70] sm:$0xff]   ;;  %v1129_v5 = vld [vmem:[%s1441_s29 + $0x68] sm:$0xff]   ;;  %p885_p7 = scmp.ne.s32.totalorder %s1295_s15, 2 }
  0x49   : > { %v1126_v2 = vld [vmem:[%s1441_s29 + $0x38] sm:$0xff]   ;;  %971 = vmatprep.subr.bf16.mxu0 %v1125_v1  ;;  %1035 = vmatprep.subr.bf16.mxu1 %v1125_v1  ;;  %v1128_v4 = vld [vmem:[%s1441_s29 + $0x30] sm:$0xff]   ;;  %v1130_v6 = vld [vmem:[%s1441_s29 + $0x28] sm:$0xff]  }
  0x4a   : > { %972 = vmatpush3.bf16.msra.mxu0 %v1126_v2  ;;  %1043 = vmatpush3.bf16.msra.mxu1 %v1126_v2  ;;  %v1131_v7 = vld [vmem:[%s1441_s29 + $0x60] sm:$0xff]   ;;  %v1133_v9 = vld [vmem:[%s1441_s29 + $0x58] sm:$0xff]   ;;  %v1135_v11 = vld [vmem:[%s1441_s29 + $0x50] sm:$0xff]  }
  0x4b   : > { %973 = vmatprep.subr.bf16.mxu0 %v1127_v3  ;;  %1036 = vmatprep.subr.bf16.mxu1 %v1127_v3  ;;  %v1132_v8 = vld [vmem:[%s1441_s29 + $0x20] sm:$0xff]   ;;  %v1134_v10 = vld [vmem:[%s1441_s29 + $0x18] sm:$0xff]   ;;  %v1136_v14 = vld [vmem:[%s1441_s29 + $0x10] sm:$0xff]  }
  0x4c   : > { %v1143_v12 = vld [vmem:[%s1435_s22 + $0x4] ss:$8 sps:$4 sm:$0xff]   ;;  %v1141_v19 = vld [vmem:[%s1435_s22] ss:$8 sps:$4 sm:$0xff]   ;;  %v1147_v21 = vld [vmem:[%s1435_s22 + $0x14] ss:$8 sps:$4 sm:$0xff]  }
  0x4d   : > { %v1146_v13 = vld [vmem:[%s1435_s22 + $0x44] ss:$8 sps:$4 sm:$0xff]   ;;  %543 = vmatprep.mubr.bf16.mxu0 %v1143_v12  ;;  %v1144_v20 = vld [vmem:[%s1435_s22 + $0x40] ss:$8 sps:$4 sm:$0xff]   ;;  %v1149_v22 = vld [vmem:[%s1435_s22 + $0x54] ss:$8 sps:$4 sm:$0xff]  }
  0x4e   : > { %974 = vmatpush3.bf16.msra.mxu0 %v1128_v4  ;;  %1044 = vmatpush3.bf16.msra.mxu1 %v1128_v4  ;;  %v1137_v15 = vld [vmem:[%s1441_s29 + $0x48] sm:$0xff]   ;;  %v1139_v17 = vld [vmem:[%s1441_s29 + $0x40] sm:$0xff]   ;;  %v1151_v23 = vld [vmem:[%s1435_s22 + $0x10] ss:$8 sps:$4 sm:$0xff]  }
  0x4f   : > { %975 = vmatprep.subr.bf16.mxu0 %v1129_v5  ;;  %1037 = vmatprep.subr.bf16.mxu1 %v1129_v5  ;;  %v1138_v16 = vld [vmem:[%s1441_s29 + $0x8] sm:$0xff]   ;;  %v1140_v18 = vld [vmem:[%s1441_s29] sm:$0xff]   ;;  %v1152_v24 = vld [vmem:[%s1435_s22 + $0x50] ss:$8 sps:$4 sm:$0xff]  }
  0x50   : > { %575 = vmatprep.mubr.bf16.mxu1 %v1146_v13  ;;  %v1153_v25 = vld [vmem:[%s1435_s22 + $0x24] ss:$8 sps:$4 sm:$0xff]   ;;  %v1157_v27 = vld [vmem:[%s1435_s22 + $0x20] ss:$8 sps:$4 sm:$0xff]   ;;  %v1159_v29 = vld [vmem:[%s1435_s22 + $0x34] ss:$8 sps:$4 sm:$0xff]  }
  0x51   : > { %v1155_v26 = vld [vmem:[%s1435_s22 + $0x64] ss:$8 sps:$4 sm:$0xff]   ;;  %v1158_v28 = vld [vmem:[%s1435_s22 + $0x60] ss:$8 sps:$4 sm:$0xff]   ;;  %v1161_v30 = vld [vmem:[%s1435_s22 + $0x74] ss:$8 sps:$4 sm:$0xff]  }
  0x52   : > { %976 = vmatpush3.bf16.msra.mxu0 %v1130_v6  ;;  %1045 = vmatpush3.bf16.msra.mxu1 %v1130_v6  ;;  %v1163_v31 = vld [vmem:[%s1435_s22 + $0x30] ss:$8 sps:$4 sm:$0xff]   ;;  %v279_v37 = vld [vmem:[#allocation2 + $0x40] sm:$0xff] }
  0x53   : > { %977 = vmatprep.subr.bf16.mxu0 %v1131_v7  ;;  %1038 = vmatprep.subr.bf16.mxu1 %v1131_v7  ;;  %v1164_v32 = vld [vmem:[%s1435_s22 + $0x70] ss:$8 sps:$4 sm:$0xff]   ;;  %v272_v45 = vld [vmem:[#allocation2] sm:$0xff] }
  0x54   : > { %v271_v35 = vld [vmem:[#allocation2 + $0x30] sm:$0xff]  ;;  %v280_v47 = vld [vmem:[#allocation2 + $0x20] sm:$0xff]  ;;  %v273_v55 = vld [vmem:[#allocation2 + $0x58] sm:$0xff] }
  0x55   : > { %v281_v57 = vld [vmem:[#allocation2 + $0x10] sm:$0xff]  ;;  %v274_v1 = vld [vmem:[#allocation2 + $0x18] sm:$0xff]  ;;  %v283_v13 = vld [vmem:[#allocation2 + $0x60] sm:$0xff] }
  0x56   : > { %978 = vmatpush3.bf16.msra.mxu0 %v1132_v8  ;;  %1046 = vmatpush3.bf16.msra.mxu1 %v1132_v8  ;;  %v282_v3 = vld [vmem:[#allocation2 + $0x38] sm:$0xff] }
  0x57   : > { %979 = vmatprep.subr.bf16.mxu0 %v1133_v9  ;;  %1039 = vmatprep.subr.bf16.mxu1 %v1133_v9 }
  0x5a   : > { %980 = vmatpush3.bf16.msra.mxu0 %v1134_v10  ;;  %1047 = vmatpush3.bf16.msra.mxu1 %v1134_v10 }
  0x5b   : > { %981 = vmatprep.subr.bf16.mxu0 %v1135_v11  ;;  %1040 = vmatprep.subr.bf16.mxu1 %v1135_v11  ;;  %v275_v11 = vld [vmem:[#allocation2 + $0x50] sm:$0xff] }
  0x5e   : > { %982 = vmatpush3.bf16.msra.mxu0 %v1136_v14  ;;  %1048 = vmatpush3.bf16.msra.mxu1 %v1136_v14 }
  0x5f   : > { %983 = vmatprep.subr.bf16.mxu0 %v1137_v15  ;;  %1041 = vmatprep.subr.bf16.mxu1 %v1137_v15 }
  0x62   : > { %984 = vmatpush3.bf16.msra.mxu0 %v1138_v16  ;;  %1049 = vmatpush3.bf16.msra.mxu1 %v1138_v16 }
  0x63   : > { %985 = vmatprep.subr.bf16.mxu0 %v1139_v17  ;;  %1042 = vmatprep.subr.bf16.mxu1 %v1139_v17 }
  0x66   : > { %986 = vmatpush3.bf16.msra.mxu0 %v1140_v18  ;;  %1050 = vmatpush3.bf16.msra.mxu1 %v1140_v18 }
  0x69   : > { %544 = vmatmul.mubr.bf16.vlgmr.msra.gmra.mxu0 %v1141_v19  ;;  %576 = vmatmul.mubr.bf16.vlgmr.msra.gmra.mxu1 %v1144_v20 }
  0x6a   : > { %551 = vmatprep.mubr.bf16.mxu0 %v1147_v21  ;;  %583 = vmatprep.mubr.bf16.mxu1 %v1149_v22  ;;  %v276_v21 = vld [vmem:[#allocation2 + $0x68] sm:$0xff] }
  0x71   : > { %552 = vmatmul.mubr.bf16.gmra.mxu0 %v1151_v23  ;;  %584 = vmatmul.mubr.bf16.gmra.mxu1 %v1152_v24  ;;  %v284_v23 = vld [vmem:[#allocation2 + $0x70] sm:$0xff] }
  0x72   : > { %559 = vmatprep.mubr.bf16.mxu0 %v1153_v25  ;;  %591 = vmatprep.mubr.bf16.mxu1 %v1155_v26 }
  0x79   : > { %560 = vmatmul.mubr.bf16.gmra.mxu0 %v1157_v27  ;;  %592 = vmatmul.mubr.bf16.gmra.mxu1 %v1158_v28 }
  0x7a   : > { %567 = vmatprep.mubr.bf16.mxu0 %v1159_v29  ;;  %599 = vmatprep.mubr.bf16.mxu1 %v1161_v30 }
  0x81   : > { %568 = vmatmul.mubr.bf16.gmra.mxu0 %v1163_v31  ;;  %600 = vmatmul.mubr.bf16.gmra.mxu1 %v1164_v32  ;;  %v277_v31 = vld [vmem:[#allocation2 + $0x8] sm:$0xff] }
 0x129   : > { %v987_v33 = vpop.f32.mrf.mxu0  ;;  %v1011_v34 = vpop.f32.mrf.mxu1 }
 0x12b   : > { %v988_v36 = vpop.f32.mrf.mxu0  ;;  %v1012_v38 = vpop.f32.mrf.mxu1 }
 0x12c   : > { %v989_v39 = vadd.f32 %v988_v36, %v987_v33  ;;  %v1013_v40 = vadd.f32 %v1012_v38, %v1011_v34  ;;  %v285_v33 = vld [vmem:[#allocation2 + $0x78] sm:$0xff] }
 0x12d   : > { %v990_v41 = vpop.f32.mrf.mxu0  ;;  %v1014_v42 = vpop.f32.mrf.mxu1 }
 0x12e   : > { %v608_v43 = vadd.f32 %v989_v39, %v271_v35  ;;  %v616_v44 = vadd.f32 %v1013_v40, %v279_v37 }
 0x12f   : > { %v991_v46 = vpop.f32.mrf.mxu0  ;;  %v1015_v48 = vpop.f32.mrf.mxu1 }
 0x130   : > { %624 = vst [vmem:[#allocation2 + $0x30] sm:$0xff] %v608_v43  ;;  %632 = vst [vmem:[#allocation2 + $0x40] sm:$0xff] %v616_v44  ;;  %v992_v49 = vadd.f32 %v991_v46, %v990_v41  ;;  %v1016_v50 = vadd.f32 %v1015_v48, %v1014_v42  ;;  %v278_v41 = vld [vmem:[#allocation2 + $0x48] sm:$0xff] }
 0x131   : > { %v993_v51 = vpop.f32.mrf.mxu0  ;;  %v1017_v52 = vpop.f32.mrf.mxu1  ;;  %v286_v43 = vld [vmem:[#allocation2 + $0x28] sm:$0xff] }
 0x132   : > { %v609_v53 = vadd.f32 %v992_v49, %v272_v45  ;;  %v617_v54 = vadd.f32 %v1016_v50, %v280_v47 }
 0x133   : > { %v994_v56 = vpop.f32.mrf.mxu0  ;;  %v1018_v58 = vpop.f32.mrf.mxu1 }
 0x134   : > { %625 = vst [vmem:[#allocation2] sm:$0xff] %v609_v53  ;;  %633 = vst [vmem:[#allocation2 + $0x20] sm:$0xff] %v617_v54  ;;  %v995_v59 = vadd.f32 %v994_v56, %v993_v51  ;;  %v1019_v60 = vadd.f32 %v1018_v58, %v1017_v52 }
 0x135   : > { %v996_v61 = vpop.f32.mrf.mxu0  ;;  %v1020_v62 = vpop.f32.mrf.mxu1 }
 0x136   : > { %v610_v63 = vadd.f32 %v995_v59, %v273_v55  ;;  %v618_v0 = vadd.f32 %v1019_v60, %v281_v57 }
 0x137   : > { %v997_v2 = vpop.f32.mrf.mxu0  ;;  %v1021_v4 = vpop.f32.mrf.mxu1 }
 0x138   : > { %626 = vst [vmem:[#allocation2 + $0x58] sm:$0xff] %v610_v63  ;;  %634 = vst [vmem:[#allocation2 + $0x10] sm:$0xff] %v618_v0  ;;  %v998_v5 = vadd.f32 %v997_v2, %v996_v61  ;;  %v1022_v6 = vadd.f32 %v1021_v4, %v1020_v62 }
 0x139   : > { %v999_v7 = vpop.f32.mrf.mxu0  ;;  %v1023_v8 = vpop.f32.mrf.mxu1 }
 0x13a   : > { %v611_v9 = vadd.f32 %v998_v5, %v274_v1  ;;  %v619_v10 = vadd.f32 %v1022_v6, %v282_v3 }
 0x13b   : > { %v1000_v12 = vpop.f32.mrf.mxu0  ;;  %v1024_v14 = vpop.f32.mrf.mxu1 }
 0x13c   : > { %627 = vst [vmem:[#allocation2 + $0x18] sm:$0xff] %v611_v9  ;;  %635 = vst [vmem:[#allocation2 + $0x38] sm:$0xff] %v619_v10  ;;  %v1001_v15 = vadd.f32 %v1000_v12, %v999_v7  ;;  %v1025_v16 = vadd.f32 %v1024_v14, %v1023_v8 }
 0x13d   : > { %v1002_v17 = vpop.f32.mrf.mxu0  ;;  %v1026_v18 = vpop.f32.mrf.mxu1 }
 0x13e   : > { %v612_v19 = vadd.f32 %v1001_v15, %v275_v11  ;;  %v620_v20 = vadd.f32 %v1025_v16, %v283_v13 }
 0x13f   : > { %v1003_v22 = vpop.f32.mrf.mxu0  ;;  %v1027_v24 = vpop.f32.mrf.mxu1 }
 0x140   : > { %628 = vst [vmem:[#allocation2 + $0x50] sm:$0xff] %v612_v19  ;;  %636 = vst [vmem:[#allocation2 + $0x60] sm:$0xff] %v620_v20  ;;  %v1004_v25 = vadd.f32 %v1003_v22, %v1002_v17  ;;  %v1028_v26 = vadd.f32 %v1027_v24, %v1026_v18 }
 0x141   : > { %v1005_v27 = vpop.f32.mrf.mxu0  ;;  %v1029_v28 = vpop.f32.mrf.mxu1 }
 0x142   : > { %v613_v29 = vadd.f32 %v1004_v25, %v276_v21  ;;  %v621_v30 = vadd.f32 %v1028_v26, %v284_v23 }
 0x143   : > { %v1006_v32 = vpop.f32.mrf.mxu0  ;;  %v1030_v34 = vpop.f32.mrf.mxu1 }
 0x144   : > { %629 = vst [vmem:[#allocation2 + $0x68] sm:$0xff] %v613_v29  ;;  %637 = vst [vmem:[#allocation2 + $0x70] sm:$0xff] %v621_v30  ;;  %v1007_v35 = vadd.f32 %v1006_v32, %v1005_v27  ;;  %v1031_v36 = vadd.f32 %v1030_v34, %v1029_v28 }
 0x145   : > { %v1008_v37 = vpop.f32.mrf.mxu0  ;;  %v1032_v38 = vpop.f32.mrf.mxu1 }
 0x146   : > { %v614_v39 = vadd.f32 %v1007_v35, %v277_v31  ;;  %v622_v40 = vadd.f32 %v1031_v36, %v285_v33 }
 0x147   : > { %v1009_v42 = vpop.f32.mrf.mxu0  ;;  %v1033_v44 = vpop.f32.mrf.mxu1 }
 0x148   : > { %630 = vst [vmem:[#allocation2 + $0x8] sm:$0xff] %v614_v39  ;;  %638 = vst [vmem:[#allocation2 + $0x78] sm:$0xff] %v622_v40  ;;  %v1010_v45 = vadd.f32 %v1009_v42, %v1008_v37  ;;  %v1034_v46 = vadd.f32 %v1033_v44, %v1032_v38  ;;  %643 = sbr.rel (%p885_p7) target bundleno = 344 (0x158), region = 48 }
 0x14a   : > { %v615_v47 = vadd.f32 %v1010_v45, %v278_v41  ;;  %v623_v48 = vadd.f32 %v1034_v46, %v286_v43 }
 0x14c   : > { %631 = vst [vmem:[#allocation2 + $0x48] sm:$0xff] %v615_v47  ;;  %639 = vst [vmem:[#allocation2 + $0x28] sm:$0xff] %v623_v48 }
 0x14d   : > { %v644_v49 = vld [vmem:[#allocation2 + $0x30] sm:$0xff]  ;;  %v645_v50 = vld [vmem:[#allocation2] sm:$0xff]  ;;  %v646_v51 = vld [vmem:[#allocation2 + $0x58] sm:$0xff] }
 0x14e   : > { %v927_v52 = vpack.c.bf16 %v645_v50, %v644_v49  ;;  %v647_v53 = vld [vmem:[#allocation2 + $0x18] sm:$0xff]  ;;  %v648_v54 = vld [vmem:[#allocation2 + $0x50] sm:$0xff]  ;;  %v649_v55 = vld [vmem:[#allocation2 + $0x68] sm:$0xff] }
 0x14f   : > { %v932_v56 = vpack.c.bf16 %v647_v53, %v646_v51  ;;  %v937_v57 = vpack.c.bf16 %v649_v55, %v648_v54  ;;  %v650_v58 = vld [vmem:[#allocation2 + $0x8] sm:$0xff]  ;;  %v652_v60 = vld [vmem:[#allocation2 + $0x40] sm:$0xff]  ;;  %v654_v63 = vld [vmem:[#allocation2 + $0x10] sm:$0xff] }
 0x150   : > { %928 = vst [vmem:[#allocation8] sm:$0xff] %v927_v52   ;;  %v653_v62 = vld [vmem:[#allocation2 + $0x20] sm:$0xff]  ;;  %v655_v0 = vld [vmem:[#allocation2 + $0x38] sm:$0xff]  ;;  %v657_v4 = vld [vmem:[#allocation2 + $0x70] sm:$0xff] }
 0x151   : > { %964 = vst [vmem:[#allocation8 + $0x8] sm:$0xff] %v932_v56   ;;  %965 = vst [vmem:[#allocation8 + $0x10] sm:$0xff] %v937_v57   ;;  %v947_v1 = vpack.c.bf16 %v653_v62, %v652_v60  ;;  %v952_v2 = vpack.c.bf16 %v655_v0, %v654_v63  ;;  %v656_v3 = vld [vmem:[#allocation2 + $0x60] sm:$0xff]  ;;  %v658_v5 = vld [vmem:[#allocation2 + $0x78] sm:$0xff] }
 0x152   : > { %v957_v6 = vpack.c.bf16 %v657_v4, %v656_v3 }
 0x153   : > { %v651_v59 = vld [vmem:[#allocation2 + $0x48] sm:$0xff]  ;;  %967 = vst [vmem:[#allocation8 + $0x20] sm:$0xff] %v947_v1   ;;  %968 = vst [vmem:[#allocation8 + $0x28] sm:$0xff] %v952_v2  }
 0x154   : > { %v942_v61 = vpack.c.bf16 %v651_v59, %v650_v58  ;;  %v659_v7 = vld [vmem:[#allocation2 + $0x28] sm:$0xff]  ;;  %969 = vst [vmem:[#allocation8 + $0x30] sm:$0xff] %v957_v6  }
 0x155   : > { %v962_v8 = vpack.c.bf16 %v659_v7, %v658_v5 }
 0x156   : > { %966 = vst [vmem:[#allocation8 + $0x18] sm:$0xff] %v942_v61  }
 0x157   : > { %970 = vst [vmem:[#allocation8 + $0x38] sm:$0xff] %v962_v8  }
 0x158 PF: > { %p1486_p11 = scmp.eq.s32.totalorder %s839_s18, 2  ;;  %s1312_s23 = smov [#allocation8]  }
 0x159   : > { %s749_s4 = sshll.u32 %s1312_s23, 4  ;;  %s750_s4 = int_to_ptr.vmem [resolvable:$true] %s749_s4 }
 0x15a   : > { %s1221_s8 = scalar_lea.vmem %s750_s4, 1024  ;;  %p1228_p6 = scmp.lt.s32.totalorder %s750_s4, %s750_s4 }
 0x15b   : > { %p1222_p3 = scmp.ne.s32.totalorder %s750_s4, %s1221_s8  ;;  %p1229_p8 = scmp.lt.s32.totalorder %s1221_s8, %s1221_s8 }
 0x15d   : > { %p1223_p4 = pnand %p1222_p3, %p1486_p11  ;;  %p1230_p12 = por %p1229_p8, %p1228_p6 }
 0x15f   : > { %p1224_p5 = pneg %p1223_p4 }
 0x161   : > { %p1231_p13 = pnand %p1230_p12, %p1224_p5 }
 0x163   : > { %1234 = shalt.err (!%p1231_p13)
}
 0x164   : > { %s1313_s9 = smov 64   ;;  %s1314_s18 = smov 4  }
 0x165   : > { %1056 = dma.vmem_to_hbm [thread:$0]  (%p1486_p11), %s750_s4, 1024, %s1522_s3, [#allocation5], %s1313_s9, %s1313_s9, %s1314_s18  }
 0x166   : > { %1278 = dma.done.wait (%p1486_p11), [#allocation5], 1024  }
 0x167   : > { %1280 = vsyncadd (%p1486_p11), [#allocation5], 4294966272 }
 0x168 PF: > { %s20_s17 = sadd.s32 1, %s1303_s17   ;;  %s1528_s12 = smov %s1287_s13 }
 0x169   : > { %p17_p10 = scmp.ge.s32.totalorder %s20_s17, 5   ;;  %s1529_s13 = smov %s1291_s14 }
 0x16a   : > { %s1530_s14 = smov %s1386_s24  ;;  %s1531_s15 = smov %s1299_s16 }
 0x16b   : > { %s1532_s16 = smov %s1534_s19  ;;  %19 = sbr.rel (!%p17_p10) target bundleno = 7 (0x7), region = 91 }
 0x170   :  { %765 = vsyncpa [#allocation4], 1 }
 0x171   :  { %767 = vsyncpa [#allocation4 + $0x1], 1 }
 0x172   :  { %768 = vsyncpa [#allocation7], 1 }
 0x173   :  { %770 = vsyncpa [#allocation7 + $0x1], 1 }
 0x174   :  { %771 = vsyncpa [#allocation5], 1 }
 0x175   :  { %773 = vsyncpa [#allocation5 + $0x1], 1 }

</bundles_post_ra>
